<compile_context>
chip_gen: v7x
topology: tpu7x:2x2x1
jax: 0.10.0
libtpu: 0.0.40
codegen_flags: <defaults>
</compile_context>

<pallas_src>
import functools

import jax
import jax.numpy as jnp
from jax.experimental import pallas as pl
from jax.experimental.pallas import tpu as pltpu

IN_DIM = 512 + 128          # 640
H1, H2, H3 = 128, 64, 32
N_HEADS = 2                 # fused linear_vel + angular_vel
LEAKY_SLOPE = 0.01          # nn.LeakyReLU() default negative_slope

MIN_BATCH_TILE = 128        # lane-dense output block + MXU-aligned M dimension
MAX_BATCH_TILE = 2048       # 2048 x 640 f32 block = 5.2 MiB; x2 buffers + temps stays < 32 MiB
VMEM_LIMIT_BYTES = 32 * 1024 * 1024


def _image_mlp_kernel(x_ref,
                      w1_ref, b1_ref,
                      w2_ref, b2_ref,
                      w3_ref, b3_ref,
                      wht_ref, bht_ref,
                      out_ref):
    # f32 -> bf16 cast in VMEM (cheap VPU work hidden under the x DMA).
    x = x_ref[...].astype(jnp.bfloat16)                                       # (T, 640)

    # Linear(640 -> 128) + LeakyReLU
    h = jnp.dot(x, w1_ref[...], preferred_element_type=jnp.float32) + b1_ref[...]
    h = jnp.where(h > 0, h, LEAKY_SLOPE * h)

    # Linear(128 -> 64) + ReLU
    h = jnp.dot(h.astype(jnp.bfloat16), w2_ref[...],
                preferred_element_type=jnp.float32) + b2_ref[...]
    h = jnp.maximum(h, 0.0)

    # Linear(64 -> 32) + ReLU
    h = jnp.dot(h.astype(jnp.bfloat16), w3_ref[...],
                preferred_element_type=jnp.float32) + b3_ref[...]
    feat = jnp.maximum(h, 0.0).astype(jnp.bfloat16)                           # (T, 32)

    # Fused heads, computed directly in transposed (lane-dense) layout:
    #   out_t[n, b] = sum_k wh_t[n, k] * feat[b, k]
    # -> MXU matmul contracting dim 1 of both operands (the pl.dot trans_b=True pattern),
    #    giving a (2, T) block: heads on sublanes, batch on lanes -> unmasked stores.
    out_t = jax.lax.dot_general(
        wht_ref[...], feat,
        dimension_numbers=(((1,), (1,)), ((), ())),
        preferred_element_type=jnp.float32)                                   # (2, T)
    out_ref[...] = (out_t + bht_ref[...]).astype(out_ref.dtype)


def prepare_params(params):
    """One-time parameter prep, hoisted out of the hot forward (serving loop friendly)."""
    return dict(
        w1=params["w1"].astype(jnp.bfloat16),
        b1=params["b1"].astype(jnp.float32),
        w2=params["w2"].astype(jnp.bfloat16),
        b2=params["b2"].astype(jnp.float32),
        w3=params["w3"].astype(jnp.bfloat16),
        b3=params["b3"].astype(jnp.float32),
        # Fused + transposed heads: col0 = linear_vel, col1 = angular_vel before the transpose.
        wht=jnp.concatenate([params["wv"], params["wa"]], axis=1).T.astype(jnp.bfloat16),  # (2, 32)
        bht=jnp.concatenate([params["bv"], params["ba"]], axis=1).T.astype(jnp.float32),   # (2, 1)
    )


def _round_up(x, m):
    return ((x + m - 1) // m) * m


def _choose_batch_tile(batch):
    padded = _round_up(max(batch, 1), MIN_BATCH_TILE)
    if padded <= MIN_BATCH_TILE:
        return MIN_BATCH_TILE
    # Aim for >= 2 grid steps (v7x megacore sharding + DMA/compute overlap); cap the tile so a
    # double-buffered f32 x-tile stays comfortably inside the scoped VMEM limit on every chip.
    return min(MAX_BATCH_TILE, _round_up(pl.cdiv(padded, 2), MIN_BATCH_TILE))


@functools.partial(jax.jit, static_argnames=("batch_tile",))
def image_mlp_forward(x, prepared, batch_tile=None):
    """x: (B, 640) float32. prepared: output of prepare_params().
    Returns (linear_vel, angular_vel), each (B, 1) float32."""
    B = x.shape[0]
    tile = batch_tile if batch_tile is not None else _choose_batch_tile(B)
    assert tile % MIN_BATCH_TILE == 0, "batch tile must be a multiple of 128 (lane-dense output)"
    padded_B = _round_up(B, tile)

    x32 = x.astype(jnp.float32)
    if padded_B != B:
        x32 = jnp.pad(x32, ((0, padded_B - B), (0, 0)))

    w1, b1 = prepared["w1"], prepared["b1"]
    w2, b2 = prepared["w2"], prepared["b2"]
    w3, b3 = prepared["w3"], prepared["b3"]
    wht, bht = prepared["wht"], prepared["bht"]

    grid = (padded_B // tile,)

    # Weights/biases are tiny (~200 KB); constant index maps keep them VMEM-resident.
    def full_spec(shape):
        return pl.BlockSpec(shape, lambda i: (0,) * len(shape))

    in_specs = [
        pl.BlockSpec((tile, IN_DIM), lambda i: (i, 0)),      # x tiled over batch only (f32)
        full_spec(w1.shape), full_spec(b1.shape),
        full_spec(w2.shape), full_spec(b2.shape),
        full_spec(w3.shape), full_spec(b3.shape),
        full_spec(wht.shape), full_spec(bht.shape),
    ]
    # Transposed, lane-dense output: heads on sublanes, batch on lanes.
    out_specs = pl.BlockSpec((N_HEADS, tile), lambda i: (0, i))
    out_shape = jax.ShapeDtypeStruct((N_HEADS, padded_B), jnp.float32)

    flops = 2 * padded_B * (IN_DIM * H1 + H1 * H2 + H2 * H3 + H3 * N_HEADS)
    weight_bytes = sum(int(a.size) * a.dtype.itemsize
                       for a in (w1, b1, w2, b2, w3, b3, wht, bht))
    bytes_accessed = padded_B * IN_DIM * 4 + weight_bytes + padded_B * N_HEADS * 4
    cost = pl.CostEstimate(flops=int(flops), transcendentals=0,
                           bytes_accessed=int(bytes_accessed))

    out_t = pl.pallas_call(
        _image_mlp_kernel,
        out_shape=out_shape,
        grid_spec=pltpu.PrefetchScalarGridSpec(
            num_scalar_prefetch=0,
            grid=grid,
            in_specs=in_specs,
            out_specs=out_specs,
        ),
        compiler_params=pltpu.CompilerParams(
            dimension_semantics=("parallel",),       # batch steps shard across v7x's 2 TCs
            vmem_limit_bytes=VMEM_LIMIT_BYTES,
        ),
        cost_estimate=cost,
    )(x32, w1, b1, w2, b2, w3, b3, wht, bht)

    out_t = out_t[:, :B]                             # (2, B): row 0 = linear_vel, row 1 = angular_vel
    return out_t[0].reshape(B, 1), out_t[1].reshape(B, 1)


def init_params(key):
    """Deterministic synthetic parameters (Kaiming-uniform-ish like torch defaults)."""
    def linear(key, fan_in, fan_out):
        kw, kb = jax.random.split(key)
        bound = 1.0 / jnp.sqrt(fan_in)
        w = jax.random.uniform(kw, (fan_in, fan_out), jnp.float32, -bound, bound)
        b = jax.random.uniform(kb, (1, fan_out), jnp.float32, -bound, bound)
        return w, b

    k1, k2, k3, k4, k5 = jax.random.split(key, 5)
    w1, b1 = linear(k1, IN_DIM, H1)
    w2, b2 = linear(k2, H1, H2)
    w3, b3 = linear(k3, H2, H3)
    wv, bv = linear(k4, H3, 1)
    wa, ba = linear(k5, H3, 1)
    return dict(w1=w1, b1=b1, w2=w2, b2=b2, w3=w3, b3=b3,
                wv=wv, bv=bv, wa=wa, ba=ba)


def reference_forward(x, p):
    """Pure f32 reference matching the PyTorch module."""
    h = x @ p["w1"] + p["b1"]
    h = jnp.where(h > 0, h, LEAKY_SLOPE * h)
    h = jnp.maximum(h @ p["w2"] + p["b2"], 0.0)
    h = jnp.maximum(h @ p["w3"] + p["b3"], 0.0)
    return h @ p["wv"] + p["bv"], h @ p["wa"] + p["ba"]


if __name__ == "__main__":
    key = jax.random.PRNGKey(0)
    kx, kp = jax.random.split(key)
    params = init_params(kp)
    prepared = prepare_params(params)

    # Small single-tile case (B=16 -> one 128-row tile, padded batch sliced off).
    B = 16
    x = jax.random.normal(kx, (B, IN_DIM), jnp.float32)
    ref_lin, ref_ang = reference_forward(x, params)
    lin_vel, ang_vel = image_mlp_forward(x, prepared)
    jax.block_until_ready((lin_vel, ang_vel))
    assert lin_vel.shape == (B, 1) and ang_vel.shape == (B, 1)
    # bf16 weights/activations with f32 accumulation -> loosened tolerance vs the f32 reference.
    assert jnp.allclose(lin_vel, ref_lin, atol=2e-2, rtol=2e-2)
    assert jnp.allclose(ang_vel, ref_ang, atol=2e-2, rtol=2e-2)

    # Multi-step grid + batch-padding path (B=260 -> tile 256, grid=(2,)).
    B2 = 260
    x2 = jax.random.normal(jax.random.PRNGKey(1), (B2, IN_DIM), jnp.float32)
    ref_lin2, ref_ang2 = reference_forward(x2, params)
    lin2, ang2 = image_mlp_forward(x2, prepared)
    jax.block_until_ready((lin2, ang2))
    assert lin2.shape == (B2, 1) and ang2.shape == (B2, 1)
    assert jnp.allclose(lin2, ref_lin2, atol=2e-2, rtol=2e-2)
    assert jnp.allclose(ang2, ref_ang2, atol=2e-2, rtol=2e-2)

    print("KERNEL_OK")
</pallas_src>

<mosaic_0001>
module attributes {stable_mosaic.version = 11 : i64} {
  func.func @_image_mlp_kernel(%arg0: i32, %arg1: memref<128x640xf32, #tpu.memory_space<vmem>>, %arg2: memref<640x128xbf16, #tpu.memory_space<vmem>>, %arg3: memref<1x128xf32, #tpu.memory_space<vmem>>, %arg4: memref<128x64xbf16, #tpu.memory_space<vmem>>, %arg5: memref<1x64xf32, #tpu.memory_space<vmem>>, %arg6: memref<64x32xbf16, #tpu.memory_space<vmem>>, %arg7: memref<1x32xf32, #tpu.memory_space<vmem>>, %arg8: memref<2x32xbf16, #tpu.memory_space<vmem>>, %arg9: memref<2x1xf32, #tpu.memory_space<vmem>>, %arg10: memref<2x128xf32, #tpu.memory_space<vmem>>) attributes {dimension_semantics = [#tpu.dimension_semantics<parallel>], iteration_bounds = array<i64: 1>, scalar_prefetch = 0 : i64, scratch_operands = 0 : i64, tpu.core_type = #tpu.core_type<tc>, window_params = [{transform_indices = @transform_0, window_bounds = array<i64: 128, 640>}, {pipeline_mode = #tpu.pipeline_mode<synchronous>, transform_indices = @transform_1, window_bounds = array<i64: 640, 128>}, {pipeline_mode = #tpu.pipeline_mode<synchronous>, transform_indices = @transform_2, window_bounds = array<i64: 1, 128>}, {pipeline_mode = #tpu.pipeline_mode<synchronous>, transform_indices = @transform_3, window_bounds = array<i64: 128, 64>}, {pipeline_mode = #tpu.pipeline_mode<synchronous>, transform_indices = @transform_4, window_bounds = array<i64: 1, 64>}, {pipeline_mode = #tpu.pipeline_mode<synchronous>, transform_indices = @transform_5, window_bounds = array<i64: 64, 32>}, {pipeline_mode = #tpu.pipeline_mode<synchronous>, transform_indices = @transform_6, window_bounds = array<i64: 1, 32>}, {pipeline_mode = #tpu.pipeline_mode<synchronous>, transform_indices = @transform_7, window_bounds = array<i64: 2, 32>}, {pipeline_mode = #tpu.pipeline_mode<synchronous>, transform_indices = @transform_8, window_bounds = array<i64: 2, 1>}, {transform_indices = @transform_9, window_bounds = array<i64: 2, 128>}]} {
    %c0 = arith.constant 0 : index
    %c0_0 = arith.constant 0 : index
    %0 = vector.load %arg1[%c0, %c0_0] : memref<128x640xf32, #tpu.memory_space<vmem>>, vector<128x640xf32>
    %1 = arith.truncf %0 : vector<128x640xf32> to vector<128x640xbf16>
    %c0_1 = arith.constant 0 : index
    %c0_2 = arith.constant 0 : index
    %2 = vector.load %arg2[%c0_1, %c0_2] : memref<640x128xbf16, #tpu.memory_space<vmem>>, vector<640x128xbf16>
    %cst = arith.constant dense<0.000000e+00> : vector<128x128xf32>
    %3 = tpu.matmul %1, %2, %cst {dimension_numbers = #tpu.dot_dimension_numbers<[1], [0], [0], [1], [0, 0, 1, 1], [], []>} : vector<128x640xbf16>, vector<640x128xbf16>, vector<128x128xf32> -> vector<128x128xf32>
    %c0_3 = arith.constant 0 : index
    %c0_4 = arith.constant 0 : index
    %4 = vector.load %arg3[%c0_3, %c0_4] : memref<1x128xf32, #tpu.memory_space<vmem>>, vector<1x128xf32>
    %5 = vector.broadcast %4 : vector<1x128xf32> to vector<128x128xf32>
    %6 = arith.addf %3, %5 : vector<128x128xf32>
    %cst_5 = arith.constant 0.000000e+00 : f32
    %7 = vector.broadcast %cst_5 : f32 to vector<128x128xf32>
    %8 = arith.cmpf ogt, %6, %7 : vector<128x128xf32>
    %cst_6 = arith.constant 0.00999999977 : f32
    %9 = vector.broadcast %cst_6 : f32 to vector<128x128xf32>
    %10 = arith.mulf %9, %6 : vector<128x128xf32>
    %11 = arith.select %8, %6, %10 : vector<128x128xi1>, vector<128x128xf32>
    %12 = arith.truncf %11 : vector<128x128xf32> to vector<128x128xbf16>
    %c0_7 = arith.constant 0 : index
    %c0_8 = arith.constant 0 : index
    %13 = vector.load %arg4[%c0_7, %c0_8] : memref<128x64xbf16, #tpu.memory_space<vmem>>, vector<128x64xbf16>
    %cst_9 = arith.constant dense<0.000000e+00> : vector<128x64xf32>
    %14 = tpu.matmul %12, %13, %cst_9 {dimension_numbers = #tpu.dot_dimension_numbers<[1], [0], [0], [1], [0, 0, 1, 1], [], []>} : vector<128x128xbf16>, vector<128x64xbf16>, vector<128x64xf32> -> vector<128x64xf32>
    %c0_10 = arith.constant 0 : index
    %c0_11 = arith.constant 0 : index
    %15 = vector.load %arg5[%c0_10, %c0_11] : memref<1x64xf32, #tpu.memory_space<vmem>>, vector<1x64xf32>
    %16 = vector.broadcast %15 : vector<1x64xf32> to vector<128x64xf32>
    %17 = arith.addf %14, %16 : vector<128x64xf32>
    %cst_12 = arith.constant 0.000000e+00 : f32
    %18 = vector.broadcast %cst_12 : f32 to vector<128x64xf32>
    %19 = arith.maximumf %17, %18 : vector<128x64xf32>
    %20 = arith.truncf %19 : vector<128x64xf32> to vector<128x64xbf16>
    %c0_13 = arith.constant 0 : index
    %c0_14 = arith.constant 0 : index
    %21 = vector.load %arg6[%c0_13, %c0_14] : memref<64x32xbf16, #tpu.memory_space<vmem>>, vector<64x32xbf16>
    %cst_15 = arith.constant dense<0.000000e+00> : vector<128x32xf32>
    %22 = tpu.matmul %20, %21, %cst_15 {dimension_numbers = #tpu.dot_dimension_numbers<[1], [0], [0], [1], [0, 0, 1, 1], [], []>} : vector<128x64xbf16>, vector<64x32xbf16>, vector<128x32xf32> -> vector<128x32xf32>
    %c0_16 = arith.constant 0 : index
    %c0_17 = arith.constant 0 : index
    %23 = vector.load %arg7[%c0_16, %c0_17] : memref<1x32xf32, #tpu.memory_space<vmem>>, vector<1x32xf32>
    %24 = vector.broadcast %23 : vector<1x32xf32> to vector<128x32xf32>
    %25 = arith.addf %22, %24 : vector<128x32xf32>
    %cst_18 = arith.constant 0.000000e+00 : f32
    %26 = vector.broadcast %cst_18 : f32 to vector<128x32xf32>
    %27 = arith.maximumf %25, %26 : vector<128x32xf32>
    %28 = arith.truncf %27 : vector<128x32xf32> to vector<128x32xbf16>
    %c0_19 = arith.constant 0 : index
    %c0_20 = arith.constant 0 : index
    %29 = vector.load %arg8[%c0_19, %c0_20] : memref<2x32xbf16, #tpu.memory_space<vmem>>, vector<2x32xbf16>
    %cst_21 = arith.constant dense<0.000000e+00> : vector<2x128xf32>
    %30 = tpu.matmul %29, %28, %cst_21 {dimension_numbers = #tpu.dot_dimension_numbers<[1], [1], [0], [0], [0, 0, 1, 0], [], []>} : vector<2x32xbf16>, vector<128x32xbf16>, vector<2x128xf32> -> vector<2x128xf32>
    %c0_22 = arith.constant 0 : index
    %c0_23 = arith.constant 0 : index
    %31 = vector.load %arg9[%c0_22, %c0_23] : memref<2x1xf32, #tpu.memory_space<vmem>>, vector<2x1xf32>
    %32 = vector.broadcast %31 : vector<2x1xf32> to vector<2x128xf32>
    %33 = arith.addf %30, %32 : vector<2x128xf32>
    %c0_24 = arith.constant 0 : index
    %c0_25 = arith.constant 0 : index
    %34 = vector.load %arg10[%c0_24, %c0_25] : memref<2x128xf32, #tpu.memory_space<vmem>>, vector<2x128xf32>
    tpu.vector_store %arg10[%c0_24, %c0_25], %33 {strides = array<i32>} : memref<2x128xf32, #tpu.memory_space<vmem>>, vector<2x128xf32>,
    return
  }
  func.func @transform_0(%arg0: i32) -> (i32, i32) {
    %c0_i32 = arith.constant 0 : i32
    %c0_i32_0 = arith.constant 0 : i32
    return %arg0, %c0_i32 : i32, i32
  }
  func.func @transform_1(%arg0: i32) -> (i32, i32) {
    %c0_i32 = arith.constant 0 : i32
    %c0_i32_0 = arith.constant 0 : i32
    %c0_i32_1 = arith.constant 0 : i32
    return %c0_i32, %c0_i32_0 : i32, i32
  }
  func.func @transform_2(%arg0: i32) -> (i32, i32) {
    %c0_i32 = arith.constant 0 : i32
    %c0_i32_0 = arith.constant 0 : i32
    %c0_i32_1 = arith.constant 0 : i32
    return %c0_i32, %c0_i32_0 : i32, i32
  }
  func.func @transform_3(%arg0: i32) -> (i32, i32) {
    %c0_i32 = arith.constant 0 : i32
    %c0_i32_0 = arith.constant 0 : i32
    %c0_i32_1 = arith.constant 0 : i32
    return %c0_i32, %c0_i32_0 : i32, i32
  }
  func.func @transform_4(%arg0: i32) -> (i32, i32) {
    %c0_i32 = arith.constant 0 : i32
    %c0_i32_0 = arith.constant 0 : i32
    %c0_i32_1 = arith.constant 0 : i32
    return %c0_i32, %c0_i32_0 : i32, i32
  }
  func.func @transform_5(%arg0: i32) -> (i32, i32) {
    %c0_i32 = arith.constant 0 : i32
    %c0_i32_0 = arith.constant 0 : i32
    %c0_i32_1 = arith.constant 0 : i32
    return %c0_i32, %c0_i32_0 : i32, i32
  }
  func.func @transform_6(%arg0: i32) -> (i32, i32) {
    %c0_i32 = arith.constant 0 : i32
    %c0_i32_0 = arith.constant 0 : i32
    %c0_i32_1 = arith.constant 0 : i32
    return %c0_i32, %c0_i32_0 : i32, i32
  }
  func.func @transform_7(%arg0: i32) -> (i32, i32) {
    %c0_i32 = arith.constant 0 : i32
    %c0_i32_0 = arith.constant 0 : i32
    %c0_i32_1 = arith.constant 0 : i32
    return %c0_i32, %c0_i32_0 : i32, i32
  }
  func.func @transform_8(%arg0: i32) -> (i32, i32) {
    %c0_i32 = arith.constant 0 : i32
    %c0_i32_0 = arith.constant 0 : i32
    %c0_i32_1 = arith.constant 0 : i32
    return %c0_i32, %c0_i32_0 : i32, i32
  }
  func.func @transform_9(%arg0: i32) -> (i32, i32) {
    %c0_i32 = arith.constant 0 : i32
    %c0_i32_0 = arith.constant 0 : i32
    return %c0_i32, %arg0 : i32, i32
  }
}

</mosaic_0001>

<bundles_post_ra>
// kernel: image_mlp_forward.1
= control target key start
LH: loop header
LB: loop body
LE: loop exit
PB: predicated region body
PF: predicated region fallthrough
CT: control target
= control target key end

     0   :  { %s2252_s1 = inlined_call_operand.vmem [shape: bf16[640,128], index: 1, kind: input, shape index: {}]   ;;  %s2253_s0 = inlined_call_operand.vmem [shape: f32[128,640], index: 0, kind: input, shape index: {}]   ;;  %s2254_s3 = inlined_call_operand.vmem [shape: bf16[128,64], index: 3, kind: input, shape index: {}]   ;;  %s2255_s5 = inlined_call_operand.vmem [shape: bf16[64,32], index: 5, kind: input, shape index: {}]   ;;  %s2256_s2 = inlined_call_operand.vmem [shape: f32[1,128], index: 2, kind: input, shape index: {}]   ;;  %s2257_s4 = inlined_call_operand.vmem [shape: f32[1,64], index: 4, kind: input, shape index: {}]   ;;  %s2258_s8 = inlined_call_operand.vmem [shape: f32[2,1], index: 8, kind: input, shape index: {}]   ;;  %s2259_s6 = inlined_call_operand.vmem [shape: f32[1,32], index: 6, kind: input, shape index: {}]   ;;  %s2260_s7 = inlined_call_operand.vmem [shape: bf16[2,32], index: 7, kind: input, shape index: {}]   ;;  %s2261_s9 = inlined_call_operand.vmem [shape: f32[2,128], index: 9, kind: output, shape index: {}]  }
   0x1   :  { %v1641_v0 = vld [vmem:[%s2252_s1 + $0x40] sm:$0xff]   ;;  %v1645_v4 = vld [vmem:[%s2252_s1 + $0x48] sm:$0xff]   ;;  %v1649_v8 = vld [vmem:[%s2252_s1 + $0x50] sm:$0xff]  }
   0x2   :  { %v1642_v1 = vld [vmem:[%s2252_s1] sm:$0xff]   ;;  %1348 = vmatprep.subr.bf16.mxu0 %v1641_v0  ;;  %v1646_v5 = vld [vmem:[%s2252_s1 + $0x8] sm:$0xff]   ;;  %v1650_v9 = vld [vmem:[%s2252_s1 + $0x10] sm:$0xff]  }
   0x3   :  { %v1643_v2 = vld [vmem:[%s2252_s1 + $0xc0] sm:$0xff]   ;;  %1349 = vmatpush3.bf16.msra.mxu0 %v1642_v1  ;;  %v1647_v6 = vld [vmem:[%s2252_s1 + $0xc8] sm:$0xff]   ;;  %v1651_v10 = vld [vmem:[%s2252_s1 + $0xd0] sm:$0xff]  }
   0x4   :  { %v1644_v3 = vld [vmem:[%s2252_s1 + $0x80] sm:$0xff]   ;;  %1412 = vmatprep.subr.bf16.mxu1 %v1643_v2  ;;  %1350 = vmatprep.subr.bf16.mxu0 %v1645_v4  ;;  %v1648_v7 = vld [vmem:[%s2252_s1 + $0x88] sm:$0xff]   ;;  %v1652_v11 = vld [vmem:[%s2252_s1 + $0x90] sm:$0xff]  }
   0x5   :  { %1413 = vmatpush3.bf16.msra.mxu1 %v1644_v3  ;;  %v1653_v12 = vld [vmem:[%s2252_s1 + $0x58] sm:$0xff]   ;;  %v1657_v16 = vld [vmem:[%s2252_s1 + $0x60] sm:$0xff]   ;;  %v1661_v20 = vld [vmem:[%s2252_s1 + $0x68] sm:$0xff]  }
   0x6   :  { %1414 = vmatprep.subr.bf16.mxu1 %v1647_v6  ;;  %v1654_v13 = vld [vmem:[%s2252_s1 + $0x18] sm:$0xff]   ;;  %v1658_v17 = vld [vmem:[%s2252_s1 + $0x20] sm:$0xff]   ;;  %v1662_v21 = vld [vmem:[%s2252_s1 + $0x28] sm:$0xff]  }
   0x7   :  { %1351 = vmatpush3.bf16.msra.mxu0 %v1646_v5  ;;  %v1655_v14 = vld [vmem:[%s2252_s1 + $0xd8] sm:$0xff]   ;;  %v1659_v18 = vld [vmem:[%s2252_s1 + $0xe0] sm:$0xff]   ;;  %v1663_v22 = vld [vmem:[%s2252_s1 + $0xe8] sm:$0xff]  }
   0x8   :  { %1352 = vmatprep.subr.bf16.mxu0 %v1649_v8  ;;  %v1656_v15 = vld [vmem:[%s2252_s1 + $0x98] sm:$0xff]   ;;  %v1660_v19 = vld [vmem:[%s2252_s1 + $0xa0] sm:$0xff]   ;;  %v1664_v23 = vld [vmem:[%s2252_s1 + $0xa8] sm:$0xff]  }
   0x9   :  { %1415 = vmatpush3.bf16.msra.mxu1 %v1648_v7  ;;  %v1665_v24 = vld [vmem:[%s2252_s1 + $0x70] sm:$0xff]   ;;  %v1669_v28 = vld [vmem:[%s2252_s1 + $0x78] sm:$0xff]   ;;  %v34_v31 = vld [vmem:[%s2253_s0 + $0x8] sm:$0xff] }
   0xa   :  { %1416 = vmatprep.subr.bf16.mxu1 %v1651_v10  ;;  %v1666_v25 = vld [vmem:[%s2252_s1 + $0x30] sm:$0xff]   ;;  %v1670_v29 = vld [vmem:[%s2252_s1 + $0x38] sm:$0xff]   ;;  %v33_v35 = vld [vmem:[%s2253_s0] sm:$0xff] }
   0xb   :  { %1353 = vmatpush3.bf16.msra.mxu0 %v1650_v9  ;;  %v1667_v26 = vld [vmem:[%s2252_s1 + $0xf0] sm:$0xff]   ;;  %v1671_v30 = vld [vmem:[%s2252_s1 + $0xf8] sm:$0xff]   ;;  %v38_v36 = vld [vmem:[%s2253_s0 + $0x28] sm:$0xff] }
   0xc   :  { %1354 = vmatprep.subr.bf16.mxu0 %v1653_v12  ;;  %v1668_v27 = vld [vmem:[%s2252_s1 + $0xb0] sm:$0xff]   ;;  %v1672_v34 = vld [vmem:[%s2252_s1 + $0xb8] sm:$0xff]   ;;  %v113_v37 = vpack.c.bf16 %v38_v36, %v33_v35  ;;  %v1673_v38 = vld [vmem:[%s2252_s1 + $0x100] sm:$0xff]  }
   0xd   :  { %1417 = vmatpush3.bf16.msra.mxu1 %v1652_v11  ;;  %v39_v32 = vld [vmem:[%s2253_s0 + $0x30] sm:$0xff]  ;;  %v36_v39 = vld [vmem:[%s2253_s0 + $0x18] sm:$0xff]  ;;  %v41_v40 = vld [vmem:[%s2253_s0 + $0x40] sm:$0xff] }
   0xe   :  { %1418 = vmatprep.subr.bf16.mxu1 %v1655_v14  ;;  %v114_v33 = vpack.c.bf16 %v39_v32, %v34_v31  ;;  %v116_v41 = vpack.c.bf16 %v41_v40, %v36_v39  ;;  %v35_v42 = vld [vmem:[%s2253_s0 + $0x10] sm:$0xff]  ;;  %v40_v43 = vld [vmem:[%s2253_s0 + $0x38] sm:$0xff]  ;;  %v49_v46 = vld [vmem:[%s2253_s0 + $0x80] sm:$0xff] }
   0xf   :  { %1355 = vmatpush3.bf16.msra.mxu0 %v1654_v13  ;;  %v44_v44 = vld [vmem:[%s2253_s0 + $0x58] sm:$0xff]  ;;  %v115_v45 = vpack.c.bf16 %v40_v43, %v35_v42  ;;  %v43_v47 = vld [vmem:[%s2253_s0 + $0x50] sm:$0xff]  ;;  %v1674_v50 = vld [vmem:[%s2252_s1 + $0x108] sm:$0xff]  }
  0x10   :  { %1356 = vmatprep.subr.bf16.mxu0 %v1657_v16  ;;  %512 = vmatprep.mubr.bf16.mxu0 %v114_v33  ;;  %v48_v48 = vld [vmem:[%s2253_s0 + $0x78] sm:$0xff]  ;;  %v119_v49 = vpack.c.bf16 %v49_v46, %v44_v44  ;;  %v46_v51 = vld [vmem:[%s2253_s0 + $0x68] sm:$0xff]  ;;  %v51_v52 = vld [vmem:[%s2253_s0 + $0x90] sm:$0xff] }
  0x11   :  { %1419 = vmatpush3.bf16.msra.mxu1 %v1656_v15  ;;  %609 = vmatprep.mubr.bf16.mxu1 %v116_v41  ;;  %v45_v53 = vld [vmem:[%s2253_s0 + $0x60] sm:$0xff]  ;;  %v121_v54 = vpack.c.bf16 %v51_v52, %v46_v51  ;;  %v50_v55 = vld [vmem:[%s2253_s0 + $0x88] sm:$0xff]  ;;  %v59_v57 = vld [vmem:[%s2253_s0 + $0xd0] sm:$0xff]  ;;  %v118_v58 = vpack.c.bf16 %v48_v48, %v43_v47 }
  0x12   :  { %1420 = vmatprep.subr.bf16.mxu1 %v1659_v18  ;;  %v54_v56 = vld [vmem:[%s2253_s0 + $0xa8] sm:$0xff]  ;;  %v1675_v60 = vld [vmem:[%s2252_s1 + $0x110] sm:$0xff]   ;;  %v56_v61 = vld [vmem:[%s2253_s0 + $0xb8] sm:$0xff]  ;;  %v120_v62 = vpack.c.bf16 %v50_v55, %v45_v53 }
  0x13   :  { %1357 = vmatpush3.bf16.msra.mxu0 %v1658_v17  ;;  %v124_v59 = vpack.c.bf16 %v59_v57, %v54_v56  ;;  %v61_v63 = vld [vmem:[%s2253_s0 + $0xe0] sm:$0xff]  ;;  %v58_v2 = vld [vmem:[%s2253_s0 + $0xc8] sm:$0xff]  ;;  %v1676_v3 = vld [vmem:[%s2252_s1 + $0x118] sm:$0xff]  }
  0x14   :  { %1358 = vmatprep.subr.bf16.mxu0 %v1661_v20  ;;  %v126_v0 = vpack.c.bf16 %v61_v63, %v56_v61  ;;  %v53_v1 = vld [vmem:[%s2253_s0 + $0xa0] sm:$0xff]  ;;  %v55_v4 = vld [vmem:[%s2253_s0 + $0xb0] sm:$0xff]  ;;  %v64_v5 = vld [vmem:[%s2253_s0 + $0xf8] sm:$0xff] }
  0x15   :  { %1421 = vmatpush3.bf16.msra.mxu1 %v1660_v19  ;;  %v69_v6 = vld [vmem:[%s2253_s0 + $0x120] sm:$0xff]  ;;  %v60_v7 = vld [vmem:[%s2253_s0 + $0xd8] sm:$0xff]  ;;  %v66_v8 = vld [vmem:[%s2253_s0 + $0x108] sm:$0xff]  ;;  %v123_v10 = vpack.c.bf16 %v58_v2, %v53_v1 }
  0x16   :  { %1422 = vmatprep.subr.bf16.mxu1 %v1663_v22  ;;  %v71_v9 = vld [vmem:[%s2253_s0 + $0x130] sm:$0xff]  ;;  %v1677_v11 = vld [vmem:[%s2252_s1 + $0x120] sm:$0xff]   ;;  %v129_v12 = vpack.c.bf16 %v69_v6, %v64_v5  ;;  %v125_v13 = vpack.c.bf16 %v60_v7, %v55_v4  ;;  %v1678_v15 = vld [vmem:[%s2252_s1 + $0x128] sm:$0xff]  }
  0x17   :  { %1359 = vmatpush3.bf16.msra.mxu0 %v1662_v21  ;;  %v131_v14 = vpack.c.bf16 %v71_v9, %v66_v8  ;;  %v63_v16 = vld [vmem:[%s2253_s0 + $0xf0] sm:$0xff]  ;;  %v68_v17 = vld [vmem:[%s2253_s0 + $0x118] sm:$0xff]  ;;  %v65_v18 = vld [vmem:[%s2253_s0 + $0x100] sm:$0xff] }
  0x18   :  { %1360 = vmatprep.subr.bf16.mxu0 %v1665_v24  ;;  %v74_v19 = vld [vmem:[%s2253_s0 + $0x148] sm:$0xff]  ;;  %v79_v20 = vld [vmem:[%s2253_s0 + $0x170] sm:$0xff]  ;;  %v128_v22 = vpack.c.bf16 %v68_v17, %v63_v16  ;;  %v81_v24 = vld [vmem:[%s2253_s0 + $0x180] sm:$0xff] }
  0x19   :  { %1423 = vmatpush3.bf16.msra.mxu1 %v1664_v23  ;;  %v70_v21 = vld [vmem:[%s2253_s0 + $0x128] sm:$0xff]  ;;  %v76_v23 = vld [vmem:[%s2253_s0 + $0x158] sm:$0xff]  ;;  %v89_v33 = vld [vmem:[%s2253_s0 + $0x1c0] sm:$0xff] }
  0x1a   :  { %1424 = vmatprep.subr.bf16.mxu1 %v1667_v26  ;;  %v134_v26 = vpack.c.bf16 %v79_v20, %v74_v19  ;;  %v78_v31 = vld [vmem:[%s2253_s0 + $0x168] sm:$0xff]  ;;  %v84_v32 = vld [vmem:[%s2253_s0 + $0x198] sm:$0xff]  ;;  %v83_v42 = vld [vmem:[%s2253_s0 + $0x190] sm:$0xff] }
  0x1b   :  { %1361 = vmatpush3.bf16.msra.mxu0 %v1666_v25  ;;  %v1679_v25 = vld [vmem:[%s2252_s1 + $0x130] sm:$0xff]   ;;  %v80_v35 = vld [vmem:[%s2253_s0 + $0x178] sm:$0xff]  ;;  %v139_v39 = vpack.c.bf16 %v89_v33, %v84_v32  ;;  %v94_v44 = vld [vmem:[%s2253_s0 + $0x1e8] sm:$0xff] }
  0x1c   :  { %1362 = vmatprep.subr.bf16.mxu0 %v1669_v28  ;;  %v136_v28 = vpack.c.bf16 %v81_v24, %v76_v23  ;;  %v88_v43 = vld [vmem:[%s2253_s0 + $0x1b8] sm:$0xff]  ;;  %v85_v46 = vld [vmem:[%s2253_s0 + $0x1a0] sm:$0xff]  ;;  %v90_v47 = vld [vmem:[%s2253_s0 + $0x1c8] sm:$0xff] }
  0x1d   :  { %1425 = vmatpush3.bf16.msra.mxu1 %v1668_v27  ;;  %v130_v27 = vpack.c.bf16 %v70_v21, %v65_v18  ;;  %v138_v48 = vpack.c.bf16 %v88_v43, %v83_v42  ;;  %v140_v52 = vpack.c.bf16 %v90_v47, %v85_v46  ;;  %v98_v55 = vld [vmem:[%s2253_s0 + $0x208] sm:$0xff]  ;;  %v104_v56 = vld [vmem:[%s2253_s0 + $0x238] sm:$0xff]  ;;  %v109_v57 = vld [vmem:[%s2253_s0 + $0x260] sm:$0xff] }
  0x1e   :  { %1426 = vmatprep.subr.bf16.mxu1 %v1671_v30  ;;  %v73_v30 = vld [vmem:[%s2253_s0 + $0x140] sm:$0xff]  ;;  %v106_v61 = vld [vmem:[%s2253_s0 + $0x248] sm:$0xff]  ;;  %v149_v63 = vpack.c.bf16 %v109_v57, %v104_v56  ;;  %v103_v2 = vld [vmem:[%s2253_s0 + $0x230] sm:$0xff] }
  0x1f   :  { %1363 = vmatpush3.bf16.msra.mxu0 %v1670_v29  ;;  %v1680_v29 = vld [vmem:[%s2252_s1 + $0x138] sm:$0xff]   ;;  %v133_v36 = vpack.c.bf16 %v78_v31, %v73_v30  ;;  %v37_v4 = vld [vmem:[%s2253_s0 + $0x20] sm:$0xff]  ;;  %v42_v5 = vld [vmem:[%s2253_s0 + $0x48] sm:$0xff] }
  0x20   :  { %1529 = vmatprep.subr.bf16.mxu0 %v1673_v38  ;;  %v105_v6 = vld [vmem:[%s2253_s0 + $0x240] sm:$0xff]  ;;  %v110_v7 = vld [vmem:[%s2253_s0 + $0x268] sm:$0xff]  ;;  %v117_v9 = vpack.c.bf16 %v42_v5, %v37_v4  ;;  %v67_v17 = vld [vmem:[%s2253_s0 + $0x110] sm:$0xff] }
  0x21   :  { %1427 = vmatpush3.bf16.msra.mxu1 %v1672_v34  ;;  %v75_v34 = vld [vmem:[%s2253_s0 + $0x150] sm:$0xff]  ;;  %v72_v18 = vld [vmem:[%s2253_s0 + $0x138] sm:$0xff]  ;;  %v77_v19 = vld [vmem:[%s2253_s0 + $0x160] sm:$0xff] }
  0x22   :  { %513 = vmatmul.mubr.bf16.vlgmr.msra.gmra.mrb[0].mxu0 %v113_v37  ;;  %v86_v37 = vld [vmem:[%s2253_s0 + $0x1a8] sm:$0xff]  ;;  %v135_v40 = vpack.c.bf16 %v80_v35, %v75_v34  ;;  %v132_v21 = vpack.c.bf16 %v72_v18, %v67_v17  ;;  %v87_v23 = vld [vmem:[%s2253_s0 + $0x1b0] sm:$0xff]  ;;  %v92_v24 = vld [vmem:[%s2253_s0 + $0x1d8] sm:$0xff] }
  0x23   :  { %1530 = vmatpush3.bf16.msra.mxu0 %v1673_v38  ;;  %520 = vmatprep.mubr.bf16.mxu0 %v119_v49  ;;  %v91_v38 = vld [vmem:[%s2253_s0 + $0x1d0] sm:$0xff]  ;;  %v96_v49 = vld [vmem:[%s2253_s0 + $0x1f8] sm:$0xff]  ;;  %v82_v20 = vld [vmem:[%s2253_s0 + $0x188] sm:$0xff] }
  0x24   :  { %610 = vmatmul.mubr.bf16.vlgmr.msra.gmra.mrb[0].mxu1 %v115_v45  ;;  %1531 = vmatprep.subr.bf16.mxu0 %v1674_v50  ;;  %v141_v41 = vpack.c.bf16 %v91_v38, %v86_v37  ;;  %v99_v45 = vld [vmem:[%s2253_s0 + $0x210] sm:$0xff]  ;;  %v112_v30 = vld [vmem:[%s2253_s0 + $0x278] sm:$0xff]  ;;  %v1681_v32 = vld [vmem:[%s2254_s3] sm:$0xff]  }
  0x25   :  { %617 = vmatprep.mubr.bf16.mxu1 %v121_v54  ;;  %v144_v51 = vpack.c.bf16 %v99_v45, %v94_v44  ;;  %v93_v54 = vld [vmem:[%s2253_s0 + $0x1e0] sm:$0xff]  ;;  %1561 = vmatprep.subr.bf16.mxu1 %v1681_v32  ;;  %v1682_v33 = vld [vmem:[%s2254_s3 + $0x8] sm:$0xff]   ;;  %v1683_v34 = vld [vmem:[%s2254_s3 + $0x10] sm:$0xff]  }
  0x26   :  { %1562 = vmatpush3.bf16.msra.mxu1 %v1681_v32  ;;  %v1684_v35 = vld [vmem:[%s2254_s3 + $0x18] sm:$0xff]   ;;  %v1686_v37 = vld [vmem:[%s2254_s3 + $0x28] sm:$0xff]   ;;  %v1687_v38 = vld [vmem:[%s2254_s3 + $0x30] sm:$0xff]  }
  0x27   :  { %1532 = vmatpush3.bf16.msra.mxu0 %v1674_v50  ;;  %v101_v50 = vld [vmem:[%s2253_s0 + $0x220] sm:$0xff]  ;;  %1563 = vmatprep.subr.bf16.mxu1 %v1682_v33  ;;  %v1691_v42 = vld [vmem:[%s2255_s5 + $0x10] sm:$0xff]  }
  0x28   :  { %1533 = vmatprep.subr.bf16.mxu0 %v1675_v60  ;;  %v146_v53 = vpack.c.bf16 %v101_v50, %v96_v49  ;;  %v2142_v44 = vld [vmem:[%s2256_s2] ss:$0 sm:$0xff] }
  0x2a   :  { %521 = vmatmul.mubr.bf16.gmra.mrb[4].mxu0 %v118_v58  ;;  %v95_v58 = vld [vmem:[%s2253_s0 + $0x1f0] sm:$0xff]  ;;  %1564 = vmatpush3.bf16.msra.mxu1 %v1682_v33 }
  0x2b   :  { %528 = vmatprep.mubr.bf16.mxu0 %v124_v59  ;;  %1534 = vmatpush3.bf16.msra.mxu0 %v1675_v60  ;;  %v100_v59 = vld [vmem:[%s2253_s0 + $0x218] sm:$0xff]  ;;  %v143_v60 = vpack.c.bf16 %v98_v55, %v93_v54 }
  0x2c   :  { %618 = vmatmul.mubr.bf16.gmra.mrb[4].mxu1 %v120_v62  ;;  %1535 = vmatprep.subr.bf16.mxu0 %v1676_v3  ;;  %v111_v62 = vld [vmem:[%s2253_s0 + $0x270] sm:$0xff] }
  0x2d   :  { %625 = vmatprep.mubr.bf16.mxu1 %v126_v0  ;;  %v145_v0 = vpack.c.bf16 %v100_v59, %v95_v58  ;;  %v151_v1 = vpack.c.bf16 %v111_v62, %v106_v61  ;;  %1565 = vmatprep.subr.bf16.mxu1 %v1683_v34 }
  0x2e   :  { %1566 = vmatpush3.bf16.msra.mxu1 %v1683_v34 }
  0x2f   :  { %1536 = vmatpush3.bf16.msra.mxu0 %v1676_v3  ;;  %v108_v3 = vld [vmem:[%s2253_s0 + $0x258] sm:$0xff]  ;;  %1567 = vmatprep.subr.bf16.mxu1 %v1684_v35 }
  0x30   :  { %1537 = vmatprep.subr.bf16.mxu0 %v1677_v11  ;;  %v148_v8 = vpack.c.bf16 %v108_v3, %v103_v2 }
  0x32   :  { %529 = vmatmul.mubr.bf16.gmra.mrb[8].mxu0 %v123_v10  ;;  %v150_v10 = vpack.c.bf16 %v110_v7, %v105_v6  ;;  %1568 = vmatpush3.bf16.msra.mxu1 %v1684_v35 }
  0x33   :  { %536 = vmatprep.mubr.bf16.mxu0 %v129_v12  ;;  %1538 = vmatpush3.bf16.msra.mxu0 %v1677_v11  ;;  %v47_v11 = vld [vmem:[%s2253_s0 + $0x70] sm:$0xff]  ;;  %v52_v12 = vld [vmem:[%s2253_s0 + $0x98] sm:$0xff] }
  0x34   :  { %626 = vmatmul.mubr.bf16.gmra.mrb[8].mxu1 %v125_v13  ;;  %1539 = vmatprep.subr.bf16.mxu0 %v1678_v15  ;;  %v57_v13 = vld [vmem:[%s2253_s0 + $0xc0] sm:$0xff] }
  0x35   :  { %633 = vmatprep.mubr.bf16.mxu1 %v131_v14  ;;  %v62_v14 = vld [vmem:[%s2253_s0 + $0xe8] sm:$0xff] }
  0x36   :  { %v127_v16 = vpack.c.bf16 %v62_v14, %v57_v13 }
  0x37   :  { %1540 = vmatpush3.bf16.msra.mxu0 %v1678_v15  ;;  %v122_v15 = vpack.c.bf16 %v52_v12, %v47_v11 }
  0x38   :  { %1541 = vmatprep.subr.bf16.mxu0 %v1679_v25 }
  0x3a   :  { %537 = vmatmul.mubr.bf16.gmra.mrb[12].mxu0 %v128_v22  ;;  %v137_v22 = vpack.c.bf16 %v82_v20, %v77_v19 }
  0x3b   :  { %544 = vmatprep.mubr.bf16.mxu0 %v134_v26  ;;  %1542 = vmatpush3.bf16.msra.mxu0 %v1679_v25  ;;  %v97_v25 = vld [vmem:[%s2253_s0 + $0x200] sm:$0xff]  ;;  %v102_v26 = vld [vmem:[%s2253_s0 + $0x228] sm:$0xff] }
  0x3c   :  { %634 = vmatmul.mubr.bf16.gmra.mrb[12].mxu1 %v130_v27  ;;  %1543 = vmatprep.subr.bf16.mxu0 %v1680_v29  ;;  %v142_v27 = vpack.c.bf16 %v92_v24, %v87_v23 }
  0x3d   :  { %641 = vmatprep.mubr.bf16.mxu1 %v136_v28  ;;  %v147_v28 = vpack.c.bf16 %v102_v26, %v97_v25 }
  0x3f   :  { %1544 = vmatpush3.bf16.msra.mxu0 %v1680_v29  ;;  %v107_v29 = vld [vmem:[%s2253_s0 + $0x250] sm:$0xff] }
  0x40   :  { %v152_v31 = vpack.c.bf16 %v112_v30, %v107_v29 }
  0x42   :  { %545 = vmatmul.mubr.bf16.gmra.mrb[16].mxu0 %v133_v36  ;;  %v1685_v36 = vld [vmem:[%s2254_s3 + $0x20] sm:$0xff]  }
  0x43   :  { %552 = vmatprep.mubr.bf16.mxu0 %v139_v39  ;;  %1569 = vmatprep.subr.bf16.mxu1 %v1685_v36  ;;  %v1688_v39 = vld [vmem:[%s2254_s3 + $0x38] sm:$0xff]  }
  0x44   :  { %642 = vmatmul.mubr.bf16.gmra.mrb[16].mxu1 %v135_v40  ;;  %v1689_v40 = vld [vmem:[%s2255_s5] sm:$0xff]  }
  0x45   :  { %649 = vmatprep.mubr.bf16.mxu1 %v141_v41  ;;  %1570 = vmatpush3.bf16.msra.mxu1 %v1685_v36  ;;  %v1690_v41 = vld [vmem:[%s2255_s5 + $0x8] sm:$0xff]  }
  0x46   :  { %1571 = vmatprep.subr.bf16.mxu1 %v1686_v37  ;;  %1593 = vmatprep.subr.bf16.mxu0 %v1689_v40 }
  0x49   :  { %1572 = vmatpush3.bf16.msra.mxu1 %v1686_v37 }
  0x4a   :  { %553 = vmatmul.mubr.bf16.gmra.mrb[20].mxu0 %v138_v48  ;;  %1573 = vmatprep.subr.bf16.mxu1 %v1687_v38 }
  0x4b   :  { %560 = vmatprep.mubr.bf16.mxu0 %v144_v51 }
  0x4c   :  { %650 = vmatmul.mubr.bf16.gmra.mrb[20].mxu1 %v140_v52 }
  0x4d   :  { %657 = vmatprep.mubr.bf16.mxu1 %v146_v53  ;;  %1574 = vmatpush3.bf16.msra.mxu1 %v1687_v38 }
  0x4e   :  { %1575 = vmatprep.subr.bf16.mxu1 %v1688_v39 }
  0x51   :  { %1576 = vmatpush3.bf16.msra.mxu1 %v1688_v39 }
  0x52   :  { %561 = vmatmul.mubr.bf16.gmra.mrb[24].mxu0 %v143_v60 }
  0x53   :  { %568 = vmatprep.mubr.bf16.mxu0 %v149_v63 }
  0x54   :  { %658 = vmatmul.mubr.bf16.gmra.mrb[24].mxu1 %v145_v0 }
  0x55   :  { %665 = vmatprep.mubr.bf16.mxu1 %v151_v1 }
  0x5a   :  { %569 = vmatmul.mubr.bf16.gmra.mrb[28].mxu0 %v148_v8 }
  0x5b   :  { %1545 = vmatprep.mubr.bf16.mxu0 %v117_v9 }
  0x5c   :  { %666 = vmatmul.mubr.bf16.gmra.mrb[28].mxu1 %v150_v10 }
  0x62   :  { %1546 = vmatmul.mubr.bf16.vlgmr.msra.gmra.mrb[32].mxu0 %v122_v15 }
  0x63   :  { %1549 = vmatprep.mubr.bf16.mxu0 %v127_v16  ;;  %1594 = vmatpush3.bf16.msra.mxu0 %v1689_v40 }
  0x64   :  { %1595 = vmatprep.subr.bf16.mxu0 %v1690_v41 }
  0x67   :  { %1596 = vmatpush3.bf16.msra.mxu0 %v1690_v41 }
  0x68   :  { %1597 = vmatprep.subr.bf16.mxu0 %v1691_v42 }
  0x6a   :  { %1550 = vmatmul.mubr.bf16.gmra.mrb[36].mxu0 %v132_v21 }
  0x6b   :  { %1553 = vmatprep.mubr.bf16.mxu0 %v137_v22  ;;  %1598 = vmatpush3.bf16.msra.mxu0 %v1691_v42 }
  0x72   :  { %1554 = vmatmul.mubr.bf16.gmra.mrb[40].mxu0 %v142_v27 }
  0x73   :  { %1557 = vmatprep.mubr.bf16.mxu0 %v147_v28 }
  0x7a   :  { %1558 = vmatmul.mubr.bf16.gmra.mrb[44].mxu0 %v152_v31 }
  0xf5   :  { %v1364_v43 = vpop.f32.mrb[0].mxu0 }
  0xf6   :  { %v1365_v45 = vpop.f32.mrb[1].mxu0 }
  0xf7   :  { %v1366_v46 = vadd.f32 %v1365_v45, %v1364_v43  ;;  %v1367_v47 = vpop.f32.mrb[2].mxu0  ;;  %v1428_v48 = vpop.f32.mrb[0].mxu1 }
  0xf8   :  { %v1368_v49 = vpop.f32.mrb[3].mxu0  ;;  %v1429_v50 = vpop.f32.mrb[1].mxu1 }
  0xf9   :  { %v515_v51 = vadd.f32 %v1366_v46, %v2142_v44  ;;  %v1369_v52 = vadd.f32 %v1368_v49, %v1367_v47  ;;  %v1430_v53 = vadd.f32 %v1429_v50, %v1428_v48  ;;  %v1431_v54 = vpop.f32.mrb[2].mxu1 }
  0xfa   :  { %v1432_v55 = vpop.f32.mrb[3].mxu1 }
  0xfb   :  { %v518_v56 = vadd.f32 %v1369_v52, %v2142_v44  ;;  %v1433_v57 = vadd.f32 %v1432_v55, %v1431_v54  ;;  %v2146_v58 = vadd.f32 %v1430_v53, %v515_v51 }
  0xfd   :  { %v1370_v59 = vpop.f32.mrb[4].mxu0  ;;  %v2148_v60 = vadd.f32 %v1433_v57, %v518_v56 }
  0xfe   :  { %v1371_v61 = vpop.f32.mrb[5].mxu0 }
  0xff   :  { %v1372_v62 = vadd.f32 %v1371_v61, %v1370_v59  ;;  %v1373_v63 = vpop.f32.mrb[6].mxu0  ;;  %v1434_v0 = vpop.f32.mrb[4].mxu1 }
 0x100   :  { %v1374_v1 = vpop.f32.mrb[7].mxu0  ;;  %v1435_v2 = vpop.f32.mrb[5].mxu1 }
 0x101   :  { %v523_v3 = vadd.f32 %v1372_v62, %v2142_v44  ;;  %v1375_v4 = vadd.f32 %v1374_v1, %v1373_v63  ;;  %v1436_v5 = vadd.f32 %v1435_v2, %v1434_v0  ;;  %v1437_v6 = vpop.f32.mrb[6].mxu1 }
 0x102   :  { %v1438_v7 = vpop.f32.mrb[7].mxu1 }
 0x103   :  { %v526_v8 = vadd.f32 %v1375_v4, %v2142_v44  ;;  %v1439_v9 = vadd.f32 %v1438_v7, %v1437_v6  ;;  %v2152_v10 = vadd.f32 %v1436_v5, %v523_v3 }
 0x105   :  { %v1376_v11 = vpop.f32.mrb[8].mxu0  ;;  %v2154_v12 = vadd.f32 %v1439_v9, %v526_v8 }
 0x106   :  { %v1377_v13 = vpop.f32.mrb[9].mxu0 }
 0x107   :  { %v1378_v14 = vadd.f32 %v1377_v13, %v1376_v11  ;;  %v1379_v15 = vpop.f32.mrb[10].mxu0  ;;  %v1440_v16 = vpop.f32.mrb[8].mxu1 }
 0x108   :  { %v1380_v17 = vpop.f32.mrb[11].mxu0  ;;  %v1441_v18 = vpop.f32.mrb[9].mxu1 }
 0x109   :  { %v531_v19 = vadd.f32 %v1378_v14, %v2142_v44  ;;  %v1381_v20 = vadd.f32 %v1380_v17, %v1379_v15  ;;  %v1442_v21 = vadd.f32 %v1441_v18, %v1440_v16  ;;  %v1443_v22 = vpop.f32.mrb[10].mxu1 }
 0x10a   :  { %v1444_v23 = vpop.f32.mrb[11].mxu1 }
 0x10b   :  { %v534_v24 = vadd.f32 %v1381_v20, %v2142_v44  ;;  %v1445_v25 = vadd.f32 %v1444_v23, %v1443_v22  ;;  %v2158_v26 = vadd.f32 %v1442_v21, %v531_v19 }
 0x10d   :  { %v1382_v27 = vpop.f32.mrb[12].mxu0  ;;  %v2160_v28 = vadd.f32 %v1445_v25, %v534_v24 }
 0x10e   :  { %v1383_v29 = vpop.f32.mrb[13].mxu0 }
 0x10f   :  { %v1384_v30 = vadd.f32 %v1383_v29, %v1382_v27  ;;  %v1385_v31 = vpop.f32.mrb[14].mxu0  ;;  %v1446_v32 = vpop.f32.mrb[12].mxu1 }
 0x110   :  { %v1386_v33 = vpop.f32.mrb[15].mxu0  ;;  %v1447_v34 = vpop.f32.mrb[13].mxu1 }
 0x111   :  { %v539_v35 = vadd.f32 %v1384_v30, %v2142_v44  ;;  %v1387_v36 = vadd.f32 %v1386_v33, %v1385_v31  ;;  %v1448_v37 = vadd.f32 %v1447_v34, %v1446_v32  ;;  %v1449_v38 = vpop.f32.mrb[14].mxu1 }
 0x112   :  { %v1450_v39 = vpop.f32.mrb[15].mxu1 }
 0x113   :  { %v542_v40 = vadd.f32 %v1387_v36, %v2142_v44  ;;  %v1451_v41 = vadd.f32 %v1450_v39, %v1449_v38  ;;  %v2164_v42 = vadd.f32 %v1448_v37, %v539_v35 }
 0x115   :  { %v1388_v43 = vpop.f32.mrb[16].mxu0  ;;  %v2166_v45 = vadd.f32 %v1451_v41, %v542_v40 }
 0x116   :  { %v1389_v46 = vpop.f32.mrb[17].mxu0 }
 0x117   :  { %v1390_v47 = vadd.f32 %v1389_v46, %v1388_v43  ;;  %v1391_v48 = vpop.f32.mrb[18].mxu0  ;;  %v1452_v49 = vpop.f32.mrb[16].mxu1 }
 0x118   :  { %v1392_v50 = vpop.f32.mrb[19].mxu0  ;;  %v1453_v51 = vpop.f32.mrb[17].mxu1 }
 0x119   :  { %v547_v52 = vadd.f32 %v1390_v47, %v2142_v44  ;;  %v1393_v53 = vadd.f32 %v1392_v50, %v1391_v48  ;;  %v1454_v54 = vadd.f32 %v1453_v51, %v1452_v49  ;;  %v1455_v55 = vpop.f32.mrb[18].mxu1 }
 0x11a   :  { %v1456_v56 = vpop.f32.mrb[19].mxu1 }
 0x11b   :  { %v550_v57 = vadd.f32 %v1393_v53, %v2142_v44  ;;  %v1457_v59 = vadd.f32 %v1456_v56, %v1455_v55  ;;  %v2170_v61 = vadd.f32 %v1454_v54, %v547_v52 }
 0x11d   :  { %v1394_v62 = vpop.f32.mrb[20].mxu0  ;;  %v2172_v63 = vadd.f32 %v1457_v59, %v550_v57 }
 0x11e   :  { %v1395_v0 = vpop.f32.mrb[21].mxu0 }
 0x11f   :  { %v1396_v1 = vadd.f32 %v1395_v0, %v1394_v62  ;;  %v1397_v2 = vpop.f32.mrb[22].mxu0  ;;  %v1458_v3 = vpop.f32.mrb[20].mxu1 }
 0x120   :  { %v1398_v4 = vpop.f32.mrb[23].mxu0  ;;  %v1459_v5 = vpop.f32.mrb[21].mxu1 }
 0x121   :  { %v555_v6 = vadd.f32 %v1396_v1, %v2142_v44  ;;  %v1399_v7 = vadd.f32 %v1398_v4, %v1397_v2  ;;  %v1460_v8 = vadd.f32 %v1459_v5, %v1458_v3  ;;  %v1461_v9 = vpop.f32.mrb[22].mxu1 }
 0x122   :  { %v1462_v11 = vpop.f32.mrb[23].mxu1 }
 0x123   :  { %v558_v13 = vadd.f32 %v1399_v7, %v2142_v44  ;;  %v1463_v14 = vadd.f32 %v1462_v11, %v1461_v9  ;;  %v2176_v15 = vadd.f32 %v1460_v8, %v555_v6 }
 0x125   :  { %v1400_v16 = vpop.f32.mrb[24].mxu0  ;;  %v2178_v17 = vadd.f32 %v1463_v14, %v558_v13 }
 0x126   :  { %v1401_v18 = vpop.f32.mrb[25].mxu0 }
 0x127   :  { %v1402_v19 = vadd.f32 %v1401_v18, %v1400_v16  ;;  %v1403_v20 = vpop.f32.mrb[26].mxu0  ;;  %v1464_v21 = vpop.f32.mrb[24].mxu1 }
 0x128   :  { %v1404_v22 = vpop.f32.mrb[27].mxu0  ;;  %v1465_v23 = vpop.f32.mrb[25].mxu1 }
 0x129   :  { %v563_v24 = vadd.f32 %v1402_v19, %v2142_v44  ;;  %v1405_v25 = vadd.f32 %v1404_v22, %v1403_v20  ;;  %v1466_v27 = vadd.f32 %v1465_v23, %v1464_v21  ;;  %v1467_v29 = vpop.f32.mrb[26].mxu1 }
 0x12a   :  { %v1468_v30 = vpop.f32.mrb[27].mxu1 }
 0x12b   :  { %v566_v31 = vadd.f32 %v1405_v25, %v2142_v44  ;;  %v1469_v32 = vadd.f32 %v1468_v30, %v1467_v29  ;;  %v2182_v33 = vadd.f32 %v1466_v27, %v563_v24 }
 0x12d   :  { %v1406_v34 = vpop.f32.mrb[28].mxu0  ;;  %v2184_v35 = vadd.f32 %v1469_v32, %v566_v31 }
 0x12e   :  { %v1407_v36 = vpop.f32.mrb[29].mxu0 }
 0x12f   :  { %v1408_v37 = vadd.f32 %v1407_v36, %v1406_v34  ;;  %v1409_v38 = vpop.f32.mrb[30].mxu0  ;;  %v1470_v39 = vpop.f32.mrb[28].mxu1 }
 0x130   :  { %v1410_v40 = vpop.f32.mrb[31].mxu0  ;;  %v1471_v41 = vpop.f32.mrb[29].mxu1 }
 0x131   :  { %v571_v43 = vadd.f32 %v1408_v37, %v2142_v44  ;;  %v1411_v46 = vadd.f32 %v1410_v40, %v1409_v38  ;;  %v1472_v47 = vadd.f32 %v1471_v41, %v1470_v39  ;;  %v1473_v48 = vpop.f32.mrb[30].mxu1 }
 0x132   :  { %v1474_v49 = vpop.f32.mrb[31].mxu1 }
 0x133   :  { %v574_v50 = vadd.f32 %v1411_v46, %v2142_v44  ;;  %v1475_v51 = vadd.f32 %v1474_v49, %v1473_v48  ;;  %v2188_v52 = vadd.f32 %v1472_v47, %v571_v43 }
 0x135   :  { %v1547_v53 = vpop.f32.mrb[32].mxu0  ;;  %v2190_v54 = vadd.f32 %v1475_v51, %v574_v50 }
 0x136   :  { %v717_v55 = vadd.f32 %v1547_v53, %v2152_v10  ;;  %v708_v56 = vpop.f32.mrb[33].mxu0 }
 0x137   :  { %v709_v57 = vadd.f32 %v708_v56, %v2146_v58  ;;  %v1548_v59 = vpop.f32.mrb[34].mxu0 }
 0x138   :  { %v789_v62 = vmul.f32 0.01, %v717_v55  ;;  %v720_v0 = vadd.f32 %v1548_v59, %v2154_v12  ;;  %v711_v1 = vpop.f32.mrb[35].mxu0  ;;  %vm773_vm0 = vcmp.gt.f32.partialorder %v717_v55, 0.0 }
 0x139   :  { %v787_v2 = vmul.f32 0.01, %v709_v57  ;;  %v712_v44 = vadd.f32 %v711_v1, %v2148_v60  ;;  %vm771_vm1 = vcmp.gt.f32.partialorder %v709_v57, 0.0 }
 0x13a   :  { %vm774_vm2 = vcmp.gt.f32.partialorder %v720_v0, 0.0  ;;  %v790_v3 = vmul.f32 0.01, %v720_v0  ;;  %v805_v5 = vsel %vm773_vm0, %v717_v55, %v789_v62  ;;  %vm1058_vm0 = vcmask 523264  }
 0x13b   :  { %vm772_vm3 = vcmp.gt.f32.partialorder %v712_v44, 0.0  ;;  %v788_v4 = vmul.f32 0.01, %v712_v44  ;;  %v803_v8 = vsel %vm771_vm1, %v709_v57, %v787_v2  ;;  %vm1694_vm1 = vmmov 0  }
 0x13c   :  { %v806_v6 = vsel %vm774_vm2, %v720_v0, %v790_v3  ;;  %vm1211_vm2 = vcmask 261120  }
 0x13d   :  { %v820_v10 = vpack.c.bf16 %v806_v6, %v805_v5  ;;  %v1551_v7 = vpop.f32.mrb[36].mxu0  ;;  %v804_v58 = vsel %vm772_vm3, %v712_v44, %v788_v4 }
 0x13e   :  { %v733_v9 = vadd.f32 %v1551_v7, %v2164_v42  ;;  %v724_v11 = vpop.f32.mrb[37].mxu0  ;;  %v819_v12 = vpack.c.bf16 %v804_v58, %v803_v8 }
 0x13f   :  { %v725_v13 = vadd.f32 %v724_v11, %v2158_v26  ;;  %v1552_v14 = vpop.f32.mrb[38].mxu0 }
 0x140   :  { %v793_v16 = vmul.f32 0.01, %v733_v9  ;;  %v736_v60 = vadd.f32 %v1552_v14, %v2166_v45  ;;  %v727_v18 = vpop.f32.mrb[39].mxu0  ;;  %1577 = vmatprep.mubr.bf16.mxu1 %v819_v12  ;;  %vm777_vm4 = vcmp.gt.f32.partialorder %v733_v9, 0.0 }
 0x141   :  { %v791_v19 = vmul.f32 0.01, %v725_v13  ;;  %v728_v20 = vadd.f32 %v727_v18, %v2160_v28  ;;  %1578 = vmatmul.mubr.bf16.vlgmr.msra.gmra.mrb[32].mxu1 %v820_v10  ;;  %vm775_vm5 = vcmp.gt.f32.partialorder %v725_v13, 0.0 }
 0x142   :  { %vm778_vm6 = vcmp.gt.f32.partialorder %v736_v60, 0.0  ;;  %v794_v21 = vmul.f32 0.01, %v736_v60  ;;  %v809_v22 = vsel %vm777_vm4, %v733_v9, %v793_v16 }
 0x143   :  { %vm776_vm7 = vcmp.gt.f32.partialorder %v728_v20, 0.0  ;;  %v792_v42 = vmul.f32 0.01, %v728_v20  ;;  %v807_v26 = vsel %vm775_vm5, %v725_v13, %v791_v19 }
 0x144   :  { %v810_v23 = vsel %vm778_vm6, %v736_v60, %v794_v21 }
 0x145   :  { %v1555_v24 = vpop.f32.mrb[40].mxu0  ;;  %v808_v25 = vsel %vm776_vm7, %v728_v20, %v792_v42  ;;  %v822_v27 = vpack.c.bf16 %v810_v23, %v809_v22 }
 0x146   :  { %v749_v45 = vadd.f32 %v1555_v24, %v2176_v15  ;;  %v740_v29 = vpop.f32.mrb[41].mxu0  ;;  %v821_v30 = vpack.c.bf16 %v808_v25, %v807_v26 }
 0x147   :  { %v741_v31 = vadd.f32 %v740_v29, %v2170_v61  ;;  %v1556_v32 = vpop.f32.mrb[42].mxu0 }
 0x148   :  { %v797_v28 = vmul.f32 0.01, %v749_v45  ;;  %v752_v34 = vadd.f32 %v1556_v32, %v2178_v17  ;;  %v743_v36 = vpop.f32.mrb[43].mxu0  ;;  %1581 = vmatprep.mubr.bf16.mxu1 %v821_v30  ;;  %vm781_vm8 = vcmp.gt.f32.partialorder %v749_v45, 0.0 }
 0x149   :  { %v795_v37 = vmul.f32 0.01, %v741_v31  ;;  %v744_v38 = vadd.f32 %v743_v36, %v2172_v63  ;;  %1582 = vmatmul.mubr.bf16.gmra.mrb[36].mxu1 %v822_v27  ;;  %vm779_vm9 = vcmp.gt.f32.partialorder %v741_v31, 0.0 }
 0x14a   :  { %vm782_vm10 = vcmp.gt.f32.partialorder %v752_v34, 0.0  ;;  %v798_v39 = vmul.f32 0.01, %v752_v34  ;;  %v813_v40 = vsel %vm781_vm8, %v749_v45, %v797_v28 }
 0x14b   :  { %vm780_vm11 = vcmp.gt.f32.partialorder %v744_v38, 0.0  ;;  %v796_v15 = vmul.f32 0.01, %v744_v38  ;;  %v811_v61 = vsel %vm779_vm9, %v741_v31, %v795_v37 }
 0x14c   :  { %v814_v41 = vsel %vm782_vm10, %v752_v34, %v798_v39 }
 0x14d   :  { %v1559_v43 = vpop.f32.mrb[44].mxu0  ;;  %v812_v46 = vsel %vm780_vm11, %v744_v38, %v796_v15  ;;  %v824_v47 = vpack.c.bf16 %v814_v41, %v813_v40 }
 0x14e   :  { %v765_v17 = vadd.f32 %v1559_v43, %v2188_v52  ;;  %v756_v48 = vpop.f32.mrb[45].mxu0  ;;  %v823_v49 = vpack.c.bf16 %v812_v46, %v811_v61 }
 0x14f   :  { %v757_v50 = vadd.f32 %v756_v48, %v2182_v33  ;;  %v1560_v51 = vpop.f32.mrb[46].mxu0 }
 0x150   :  { %v801_v63 = vmul.f32 0.01, %v765_v17  ;;  %v768_v53 = vadd.f32 %v1560_v51, %v2190_v54  ;;  %v759_v55 = vpop.f32.mrb[47].mxu0  ;;  %1585 = vmatprep.mubr.bf16.mxu1 %v823_v49  ;;  %vm785_vm12 = vcmp.gt.f32.partialorder %v765_v17, 0.0  ;;  %v1692_v54 = vld [vmem:[%s2255_s5 + $0x18] sm:$0xff]  }
 0x151   :  { %v799_v56 = vmul.f32 0.01, %v757_v50  ;;  %v760_v57 = vadd.f32 %v759_v55, %v2184_v35  ;;  %1586 = vmatmul.mubr.bf16.gmra.mrb[40].mxu1 %v824_v47  ;;  %vm783_vm13 = vcmp.gt.f32.partialorder %v757_v50, 0.0  ;;  %1599 = vmatprep.subr.bf16.mxu0 %v1692_v54  ;;  %v1325_v35 = vld [vmem:[%s2257_s4] ss:$0 sm:$0xff] }
 0x152   :  { %vm786_vm14 = vcmp.gt.f32.partialorder %v768_v53, 0.0  ;;  %v802_v59 = vmul.f32 0.01, %v768_v53  ;;  %v817_v62 = vsel %vm785_vm12, %v765_v17, %v801_v63  ;;  %1600 = vmatpush3.bf16.msra.mxu0 %v1692_v54 }
 0x153   :  { %vm784_vm15 = vcmp.gt.f32.partialorder %v760_v57, 0.0  ;;  %v800_v52 = vmul.f32 0.01, %v760_v57  ;;  %v815_v1 = vsel %vm783_vm13, %v757_v50, %v799_v56 }
 0x154   :  { %v818_v0 = vsel %vm786_vm14, %v768_v53, %v802_v59 }
 0x155   :  { %v816_v33 = vsel %vm784_vm15, %v760_v57, %v800_v52  ;;  %v826_v2 = vpack.c.bf16 %v818_v0, %v817_v62  ;;  %v1693_v62 = vmov 0.0   ;;  %v1695_v0 = vmov 0  }
 0x156   :  { %v825_v44 = vpack.c.bf16 %v816_v33, %v815_v1  ;;  %1617 = vmatprep.subr.bf16.mxu1 %v1693_v62  ;;  %1640 = vset.pattern.permute.xlu0 %v1695_v0  ;;  %v1205_v1 = vld [vmem:[%s2258_s8] sm:$0x3] }
 0x157   :  { %1208 = vperm.xlu0 %1640, %v1205_v1   ;;  %v1334_v33 = vld [vmem:[%s2259_s6] ss:$0 sm:$0xff] }
 0x158   :  { %1589 = vmatprep.mubr.bf16.mxu1 %v825_v44 }
 0x159   :  { %1590 = vmatmul.mubr.bf16.gmra.mrb[44].mxu1 %v826_v2 }
 0x15a   :  { %1633 = vmatprep.mubr.msk.bf16.mxu1 %vm1694_vm1, %v1693_v62 }
 0x214   :  { %v1579_v3 = vpop.f32.mrb[32].mxu1 }
 0x215   :  { %v941_v4 = vadd.f32 %v1579_v3, %v1325_v35  ;;  %v932_v5 = vpop.f32.mrb[33].mxu1 }
 0x216   :  { %v933_v6 = vadd.f32 %v1325_v35, %v932_v5  ;;  %v1580_v10 = vpop.f32.mrb[34].mxu1 }
 0x217   :  { %v944_v7 = vadd.f32 %v1580_v10, %v1325_v35  ;;  %v935_v8 = vpop.f32.mrb[35].mxu1  ;;  %v997_v9 = vmax.f32 %v941_v4, 0.0 }
 0x218   :  { %v936_v58 = vadd.f32 %v1325_v35, %v935_v8  ;;  %v995_v12 = vmax.f32 %v933_v6, 0.0 }
 0x219   :  { %v998_v11 = vmax.f32 %v944_v7, 0.0 }
 0x21a   :  { %v996_v13 = vmax.f32 %v936_v58, 0.0 }
 0x21b   :  { %v1012_v14 = vpack.c.bf16 %v998_v11, %v997_v9 }
 0x21c   :  { %v1011_v16 = vpack.c.bf16 %v996_v13, %v995_v12  ;;  %v1583_v60 = vpop.f32.mrb[36].mxu1 }
 0x21d   :  { %v957_v18 = vadd.f32 %v1583_v60, %v1325_v35  ;;  %v948_v19 = vpop.f32.mrb[37].mxu1 }
 0x21e   :  { %v949_v20 = vadd.f32 %v1325_v35, %v948_v19  ;;  %v1584_v21 = vpop.f32.mrb[38].mxu1  ;;  %1601 = vmatprep.mubr.msk.bf16.mxu0 %vm1058_vm0, %v1011_v16 }
 0x21f   :  { %v960_v42 = vadd.f32 %v1584_v21, %v1325_v35  ;;  %v951_v22 = vpop.f32.mrb[39].mxu1  ;;  %1602 = vmatmul.mubr.msk.bf16.vlgmr.msra.gmra.mrb[48].mxu0 %vm1058_vm0, %v1012_v14  ;;  %v1001_v24 = vmax.f32 %v957_v18, 0.0 }
 0x220   :  { %v952_v23 = vadd.f32 %v1325_v35, %v951_v22  ;;  %v999_v25 = vmax.f32 %v949_v20, 0.0 }
 0x221   :  { %v1002_v26 = vmax.f32 %v960_v42, 0.0 }
 0x222   :  { %v1000_v27 = vmax.f32 %v952_v23, 0.0 }
 0x223   :  { %v1014_v45 = vpack.c.bf16 %v1002_v26, %v1001_v24 }
 0x224   :  { %v1013_v29 = vpack.c.bf16 %v1000_v27, %v999_v25  ;;  %v1587_v30 = vpop.f32.mrb[40].mxu1 }
 0x225   :  { %v973_v31 = vadd.f32 %v1587_v30, %v1325_v35  ;;  %v964_v32 = vpop.f32.mrb[41].mxu1 }
 0x226   :  { %v965_v28 = vadd.f32 %v1325_v35, %v964_v32  ;;  %v1588_v34 = vpop.f32.mrb[42].mxu1  ;;  %1605 = vmatprep.mubr.msk.bf16.mxu0 %vm1058_vm0, %v1013_v29 }
 0x227   :  { %v976_v36 = vadd.f32 %v1588_v34, %v1325_v35  ;;  %v967_v37 = vpop.f32.mrb[43].mxu1  ;;  %1606 = vmatmul.mubr.msk.bf16.gmra.mrb[52].mxu0 %vm1058_vm0, %v1014_v45  ;;  %v1005_v39 = vmax.f32 %v973_v31, 0.0 }
 0x228   :  { %v968_v38 = vadd.f32 %v1325_v35, %v967_v37  ;;  %v1003_v40 = vmax.f32 %v965_v28, 0.0 }
 0x229   :  { %v1006_v15 = vmax.f32 %v976_v36, 0.0 }
 0x22a   :  { %v1004_v41 = vmax.f32 %v968_v38, 0.0 }
 0x22b   :  { %v1016_v43 = vpack.c.bf16 %v1006_v15, %v1005_v39 }
 0x22c   :  { %v1015_v61 = vpack.c.bf16 %v1004_v41, %v1003_v40  ;;  %v1591_v46 = vpop.f32.mrb[44].mxu1 }
 0x22d   :  { %v989_v47 = vadd.f32 %v1591_v46, %v1325_v35  ;;  %v980_v17 = vpop.f32.mrb[45].mxu1 }
 0x22e   :  { %v981_v48 = vadd.f32 %v1325_v35, %v980_v17  ;;  %v1592_v49 = vpop.f32.mrb[46].mxu1  ;;  %1609 = vmatprep.mubr.msk.bf16.mxu0 %vm1058_vm0, %v1015_v61 }
 0x22f   :  { %v992_v50 = vadd.f32 %v1592_v49, %v1325_v35  ;;  %v983_v51 = vpop.f32.mrb[47].mxu1  ;;  %1610 = vmatmul.mubr.msk.bf16.gmra.mrb[56].mxu0 %vm1058_vm0, %v1016_v43  ;;  %v1009_v53 = vmax.f32 %v989_v47, 0.0 }
 0x230   :  { %v984_v63 = vadd.f32 %v1325_v35, %v983_v51  ;;  %v1007_v56 = vmax.f32 %v981_v48, 0.0 }
 0x231   :  { %v1010_v55 = vmax.f32 %v992_v50, 0.0 }
 0x232   :  { %v1008_v57 = vmax.f32 %v984_v63, 0.0 }
 0x233   :  { %v1018_v59 = vpack.c.bf16 %v1010_v55, %v1009_v53 }
 0x234   :  { %v1017_v52 = vpack.c.bf16 %v1008_v57, %v1007_v56 }
 0x236   :  { %1613 = vmatprep.mubr.msk.bf16.mxu0 %vm1058_vm0, %v1017_v52 }
 0x237   :  { %1614 = vmatmul.mubr.msk.bf16.gmra.mrb[60].mxu0 %vm1058_vm0, %v1018_v59 }
 0x2f2   :  { %v1603_v2 = vpop.f32.mrb[48].mxu0 }
 0x2f3   :  { %v1126_v44 = vadd.f32 %v1603_v2, %v1334_v33  ;;  %v1117_v54 = vpop.f32.mrb[49].mxu0 }
 0x2f4   :  { %v1118_v35 = vadd.f32 %v1334_v33, %v1117_v54  ;;  %v1604_v3 = vpop.f32.mrb[50].mxu0  ;;  %v1209_v54 = vpop.permute.xlu0 %1208 }
 0x2f5   :  { %v1129_v4 = vadd.f32 %v1604_v3, %v1334_v33  ;;  %v1120_v5 = vpop.f32.mrb[51].mxu0  ;;  %v1182_v10 = vmax.f32 %v1126_v44, 0.0  ;;  %v1204_v44 = vld [vmem:[%s2260_s7] sm:$0x1] }
 0x2f6   :  { %v1121_v6 = vadd.f32 %v1334_v33, %v1120_v5  ;;  %v1180_v8 = vmax.f32 %v1118_v35, 0.0 }
 0x2f7   :  { %v1183_v7 = vmax.f32 %v1129_v4, 0.0 }
 0x2f8   :  { %v1181_v58 = vmax.f32 %v1121_v6, 0.0 }
 0x2f9   :  { %v1197_v9 = vpack.c.bf16 %v1183_v7, %v1182_v10 }
 0x2fa   :  { %v1196_v11 = vpack.c.bf16 %v1181_v58, %v1180_v8  ;;  %v1607_v12 = vpop.f32.mrb[52].mxu0 }
 0x2fb   :  { %v1142_v13 = vadd.f32 %v1607_v12, %v1334_v33  ;;  %v1133_v14 = vpop.f32.mrb[53].mxu0  ;;  %v1219_v32 = vsel %vm1211_vm2, %v1197_v9, 0 }
 0x2fc   :  { %v1134_v16 = vadd.f32 %v1334_v33, %v1133_v14  ;;  %v1608_v60 = vpop.f32.mrb[54].mxu0  ;;  %v1216_v18 = vsel %vm1211_vm2, %v1196_v11, 0 }
 0x2fd   :  { %v1145_v19 = vadd.f32 %v1608_v60, %v1334_v33  ;;  %v1136_v20 = vpop.f32.mrb[55].mxu0  ;;  %1618 = vmatpush3.bf16.xpose.msra.mxu1 %v1216_v18  ;;  %v1186_v42 = vmax.f32 %v1142_v13, 0.0 }
 0x2fe   :  { %v1137_v21 = vadd.f32 %v1334_v33, %v1136_v20  ;;  %1619 = vmatprep.subr.bf16.mxu1 %v1693_v62  ;;  %v1184_v23 = vmax.f32 %v1134_v16, 0.0 }
 0x2ff   :  { %v1187_v22 = vmax.f32 %v1145_v19, 0.0 }
 0x300   :  { %v1185_v24 = vmax.f32 %v1137_v21, 0.0 }
 0x301   :  { %v1199_v26 = vpack.c.bf16 %v1187_v22, %v1186_v42 }
 0x302   :  { %v1198_v25 = vpack.c.bf16 %v1185_v24, %v1184_v23  ;;  %v1611_v27 = vpop.f32.mrb[56].mxu0 }
 0x303   :  { %v1158_v45 = vadd.f32 %v1611_v27, %v1334_v33  ;;  %v1149_v29 = vpop.f32.mrb[57].mxu0  ;;  %v1225_v52 = vsel %vm1211_vm2, %v1199_v26, 0 }
 0x304   :  { %v1150_v30 = vadd.f32 %v1334_v33, %v1149_v29  ;;  %v1612_v31 = vpop.f32.mrb[58].mxu0  ;;  %v1222_v48 = vsel %vm1211_vm2, %v1198_v25, 0 }
 0x305   :  { %v1161_v28 = vadd.f32 %v1612_v31, %v1334_v33  ;;  %v1152_v34 = vpop.f32.mrb[59].mxu0  ;;  %1620 = vmatpush3.bf16.xpose.msra.mxu1 %v1219_v32  ;;  %v1190_v37 = vmax.f32 %v1158_v45, 0.0 }
 0x306   :  { %v1153_v36 = vadd.f32 %v1334_v33, %v1152_v34  ;;  %1621 = vmatprep.subr.bf16.mxu1 %v1693_v62  ;;  %v1188_v39 = vmax.f32 %v1150_v30, 0.0 }
 0x307   :  { %v1191_v38 = vmax.f32 %v1161_v28, 0.0 }
 0x308   :  { %v1189_v15 = vmax.f32 %v1153_v36, 0.0 }
 0x309   :  { %v1201_v40 = vpack.c.bf16 %v1191_v38, %v1190_v37 }
 0x30a   :  { %v1200_v41 = vpack.c.bf16 %v1189_v15, %v1188_v39  ;;  %v1615_v43 = vpop.f32.mrb[60].mxu0 }
 0x30b   :  { %v1174_v61 = vadd.f32 %v1615_v43, %v1334_v33  ;;  %v1165_v46 = vpop.f32.mrb[61].mxu0  ;;  %v1231_v1 = vsel %vm1211_vm2, %v1201_v40, 0 }
 0x30c   :  { %v1166_v47 = vadd.f32 %v1334_v33, %v1165_v46  ;;  %v1616_v17 = vpop.f32.mrb[62].mxu0  ;;  %v1228_v0 = vsel %vm1211_vm2, %v1200_v41, 0 }
 0x30d   :  { %v1177_v49 = vadd.f32 %v1616_v17, %v1334_v33  ;;  %v1168_v50 = vpop.f32.mrb[63].mxu0  ;;  %1622 = vmatpush3.bf16.xpose.msra.mxu1 %v1222_v48  ;;  %v1194_v63 = vmax.f32 %v1174_v61, 0.0 }
 0x30e   :  { %v1169_v51 = vadd.f32 %v1334_v33, %v1168_v50  ;;  %1623 = vmatprep.subr.bf16.mxu1 %v1693_v62  ;;  %v1192_v55 = vmax.f32 %v1166_v47, 0.0 }
 0x30f   :  { %v1195_v53 = vmax.f32 %v1177_v49, 0.0 }
 0x310   :  { %v1193_v56 = vmax.f32 %v1169_v51, 0.0 }
 0x311   :  { %v1203_v57 = vpack.c.bf16 %v1195_v53, %v1194_v63 }
 0x312   :  { %v1202_v59 = vpack.c.bf16 %v1193_v56, %v1192_v55 }
 0x313   :  { %v1237_v2 = vsel %vm1211_vm2, %v1203_v57, 0 }
 0x314   :  { %v1234_v33 = vsel %vm1211_vm2, %v1202_v59, 0 }
 0x315   :  { %1624 = vmatpush3.bf16.xpose.msra.mxu1 %v1225_v52 }
 0x316   :  { %1625 = vmatprep.subr.bf16.mxu1 %v1693_v62 }
 0x31d   :  { %1626 = vmatpush3.bf16.xpose.msra.mxu1 %v1228_v0 }
 0x31e   :  { %1627 = vmatprep.subr.bf16.mxu1 %v1693_v62 }
 0x325   :  { %1628 = vmatpush3.bf16.xpose.msra.mxu1 %v1231_v1 }
 0x326   :  { %1629 = vmatprep.subr.bf16.mxu1 %v1693_v62 }
 0x32d   :  { %1630 = vmatpush3.bf16.xpose.msra.mxu1 %v1234_v33 }
 0x32e   :  { %1631 = vmatprep.subr.bf16.mxu1 %v1693_v62 }
 0x335   :  { %1632 = vmatpush3.bf16.xpose.msra.mxu1 %v1237_v2 }
 0x33c   :  { %1634 = vmatmul.mubr.msk.bf16.vlgmr.msra.gmra.mrb[48].mxu1 %vm1211_vm2, %v1204_v44 }
 0x40f   :  { %v1273_v35 = vpop.f32.mrb[48].mxu1 }
 0x410   :  { %v1274_v3 = vadd.f32 %v1273_v35, %v1209_v54  ;;  %v1635_v4 = vpop.f32.mrb[49].mxu1 }
 0x411   :  { %v1276_v5 = vpop.f32.mrb[50].mxu1 }
 0x412   :  { %1279 = vst [vmem:[%s2261_s9] sm:$0x3] %v1274_v3  ;;  %v1636_v6 = vpop.f32.mrb[51].mxu1 }

</bundles_post_ra>
